<compile_context>
chip_gen: v7x
topology: tpu7x:2x2x1
jax: 0.10.0
libtpu: 0.0.40
codegen_flags: <defaults>
</compile_context>

<pallas_src>
import jax
import jax.numpy as jnp
from jax.experimental import pallas as pl
from jax.experimental.pallas import tpu as pltpu

EPS = 1e-5


# --------------------------------------------------------------------------- #
# Kernel 1: fused space-to-depth + grouped 1x1 conv + per-channel stat partials
# --------------------------------------------------------------------------- #
def _conv_stats_kernel(x_ref, sel_ref, w_ref, y_ref, sum_ref, sq_ref):
    # x_ref  : (C, rb, 2*W)   -- rb output rows; lanes hold [row 2ho | row 2ho+1]
    # sel_ref: (4, 2*W, Wo)   -- 0/1 phase-selection matrices (t = 0..3)
    # w_ref  : (4, C, 1, Wo)  -- conv weight w[g, k] pre-broadcast along lanes
    # y_ref  : (C, rb, Wo)    -- pre-BN conv output block
    # sum_ref/sq_ref: (C, 1, Wo) accumulators (carried over the row-block axis)
    r = pl.program_id(1)
    C, rb, W2 = x_ref.shape
    Wo = y_ref.shape[-1]

    x2 = x_ref[...].reshape(C * rb, W2)          # merge (C, rb) -> sublane rows

    # Phase gathers on the idle MXU: p_t[(c,r), wo] = x[b, c, 2ho+dh_t, 2wo+dw_t]
    p0 = jnp.dot(x2, sel_ref[0], preferred_element_type=jnp.float32)
    p1 = jnp.dot(x2, sel_ref[1], preferred_element_type=jnp.float32)
    p2 = jnp.dot(x2, sel_ref[2], preferred_element_type=jnp.float32)
    p3 = jnp.dot(x2, sel_ref[3], preferred_element_type=jnp.float32)

    # Reproduce torch.cat([x0,x1,x2,x3], 1) channel order: row = (t*C + c)*rb + r
    cat = jnp.concatenate([p0, p1, p2, p3], axis=0)       # (4*C*rb, Wo)
    # concatenated channel j = 4g + k  ->  grouped-conv view [g, k, r, wo]
    P = cat.reshape(C, 4, rb, Wo)

    # Grouped 1x1 conv: unrolled 4-term VPU FMA (weights pre-broadcast).
    w = w_ref[...]                                         # (4, C, 1, Wo)
    y = P[:, 0] * w[0] + P[:, 1] * w[1] + P[:, 2] * w[2] + P[:, 3] * w[3]
    y_ref[...] = y

    # BatchNorm partial statistics (per channel), accumulated across row blocks.
    @pl.when(r == 0)
    def _init():
        sum_ref[...] = jnp.zeros_like(sum_ref)
        sq_ref[...] = jnp.zeros_like(sq_ref)

    sum_ref[...] += jnp.sum(y, axis=1, keepdims=True)
    sq_ref[...] += jnp.sum(y * y, axis=1, keepdims=True)


# --------------------------------------------------------------------------- #
# Kernel 2: apply per-channel BN affine (y * scale + bias), in place, lane-dense
# --------------------------------------------------------------------------- #
def _bn_apply_kernel(y_ref, scale_ref, bias_ref, o_ref):
    # y_ref/o_ref: (C, S);  scale_ref/bias_ref: (C, 1)
    o_ref[...] = y_ref[...] * scale_ref[...] + bias_ref[...]


def _choose_row_block(C, Ho, W, budget_bytes=2 * 1024 * 1024):
    """Largest divisor of Ho that is a multiple of 8 (or Ho itself) fitting VMEM."""
    per_row = C * 2 * W * 4
    max_rows = max(1, budget_bytes // per_row)
    cands = [d for d in range(1, Ho + 1) if Ho % d == 0 and (d % 8 == 0 or d == Ho)]
    fitting = [d for d in cands if d <= max_rows]
    return max(fitting) if fitting else min(cands)


def patch_merging(x, conv_w, gamma, beta):
    """x: (B, C, H, W) f32; conv_w: (C, 4, 1, 1); gamma, beta: (C,). H, W even."""
    B, C, H, W = x.shape
    Ho, Wo = H // 2, W // 2
    S = Ho * Wo

    # Free row-major view: last axis = [row 2ho (W elems) | row 2ho+1 (W elems)].
    xv = x.reshape(B, C, Ho, 2 * W)

    # Phase-selection matrices, t order matches torch.cat([x0, x1, x2, x3], 1):
    #   t=0:(dh,dw)=(0,0)  t=1:(1,0)  t=2:(0,1)  t=3:(1,1)
    j_idx = jnp.arange(2 * W, dtype=jnp.int32)[:, None]
    wo_idx = jnp.arange(Wo, dtype=jnp.int32)[None, :]
    sel = jnp.stack(
        [(j_idx == (dh * W + 2 * wo_idx + dw)).astype(jnp.float32)
         for (dh, dw) in ((0, 0), (1, 0), (0, 1), (1, 1))],
        axis=0)                                            # (4, 2W, Wo)

    w = conv_w.reshape(C, 4).astype(jnp.float32)
    w4 = jnp.broadcast_to(w.T.reshape(4, C, 1, 1), (4, C, 1, Wo))

    rb = _choose_row_block(C, Ho, W)
    n_rb = Ho // rb

    y, s1, s2 = pl.pallas_call(
        _conv_stats_kernel,
        grid=(B, n_rb),
        in_specs=[
            pl.BlockSpec((None, C, rb, 2 * W), lambda b, r: (b, 0, r, 0)),
            pl.BlockSpec((4, 2 * W, Wo), lambda b, r: (0, 0, 0)),
            pl.BlockSpec((4, C, 1, Wo), lambda b, r: (0, 0, 0, 0)),
        ],
        out_specs=(
            pl.BlockSpec((None, C, rb, Wo), lambda b, r: (b, 0, r, 0)),
            pl.BlockSpec((None, C, 1, Wo), lambda b, r: (b, 0, 0, 0)),
            pl.BlockSpec((None, C, 1, Wo), lambda b, r: (b, 0, 0, 0)),
        ),
        out_shape=(
            jax.ShapeDtypeStruct((B, C, Ho, Wo), jnp.float32),
            jax.ShapeDtypeStruct((B, C, 1, Wo), jnp.float32),
            jax.ShapeDtypeStruct((B, C, 1, Wo), jnp.float32),
        ),
        compiler_params=pltpu.CompilerParams(
            dimension_semantics=("parallel", "arbitrary"),
            vmem_limit_bytes=32 * 1024 * 1024,
        ),
    )(xv, sel, w4)

    # Tiny per-channel finalize in XLA (C-sized): biased variance, as PyTorch BN.
    n = float(B * Ho * Wo)
    tot = jnp.sum(s1, axis=(0, 2, 3))
    tot_sq = jnp.sum(s2, axis=(0, 2, 3))
    mean = tot / n
    var = jnp.maximum(tot_sq / n - mean * mean, 0.0)
    scale = gamma.astype(jnp.float32) * jax.lax.rsqrt(var + EPS)
    bias = beta.astype(jnp.float32) - mean * scale

    y_flat = y.reshape(B, C, S)                            # free view
    out = pl.pallas_call(
        _bn_apply_kernel,
        grid=(B,),
        in_specs=[
            pl.BlockSpec((None, C, S), lambda b: (b, 0, 0)),
            pl.BlockSpec((C, 1), lambda b: (0, 0)),
            pl.BlockSpec((C, 1), lambda b: (0, 0)),
        ],
        out_specs=pl.BlockSpec((None, C, S), lambda b: (b, 0, 0)),
        out_shape=jax.ShapeDtypeStruct((B, C, S), jnp.float32),
        input_output_aliases={0: 0},
        compiler_params=pltpu.CompilerParams(
            dimension_semantics=("parallel",)),
    )(y_flat, scale.reshape(C, 1), bias.reshape(C, 1))

    return out.reshape(B, C, Ho, Wo)


def patch_merging_ref(x, conv_w, gamma, beta):
    """Pure-JAX reference replicating the PyTorch forward (training-mode BN)."""
    B, C, H, W = x.shape
    x0 = x[:, :, 0::2, 0::2]
    x1 = x[:, :, 1::2, 0::2]
    x2 = x[:, :, 0::2, 1::2]
    x3 = x[:, :, 1::2, 1::2]
    xc = jnp.concatenate([x0, x1, x2, x3], axis=1)         # (B, 4C, Ho, Wo)
    Ho, Wo = H // 2, W // 2
    xg = xc.reshape(B, C, 4, Ho, Wo)
    w = conv_w.reshape(C, 4)
    y = jnp.einsum("bckhw,ck->bchw", xg, w)
    mean = y.mean(axis=(0, 2, 3), keepdims=True)
    var = ((y - mean) ** 2).mean(axis=(0, 2, 3), keepdims=True)
    yn = (y - mean) / jnp.sqrt(var + EPS)
    return yn * gamma.reshape(1, C, 1, 1) + beta.reshape(1, C, 1, 1)


if __name__ == "__main__":
    key = jax.random.PRNGKey(0)
    k_x, k_w, k_g, k_b = jax.random.split(key, 4)

    B, dim, H, W = 2, 4, 16, 16
    x = jax.random.normal(k_x, (B, dim, H, W), dtype=jnp.float32)
    conv_w = jax.random.normal(k_w, (dim, 4, 1, 1), dtype=jnp.float32) * 0.5
    gamma = 1.0 + 0.1 * jax.random.normal(k_g, (dim,), dtype=jnp.float32)
    beta = 0.1 * jax.random.normal(k_b, (dim,), dtype=jnp.float32)

    fn = jax.jit(patch_merging)
    out = jax.block_until_ready(fn(x, conv_w, gamma, beta))

    ref = patch_merging_ref(x, conv_w, gamma, beta)
    assert out.shape == (B, dim, H // 2, W // 2), out.shape
    assert jnp.allclose(out, ref, rtol=1e-4, atol=1e-4), float(jnp.max(jnp.abs(out - ref)))

    print("KERNEL_OK")
</pallas_src>

<mosaic_0001>
module attributes {stable_mosaic.version = 11 : i64} {
  func.func @_conv_stats_kernel(%arg0: i32, %arg1: i32, %arg2: memref<1x4x8x32xf32, #tpu.memory_space<vmem>>, %arg3: memref<4x32x8xf32, #tpu.memory_space<vmem>>, %arg4: memref<4x4x1x8xf32, #tpu.memory_space<vmem>>, %arg5: memref<1x4x8x8xf32, #tpu.memory_space<vmem>>, %arg6: memref<1x4x1x8xf32, #tpu.memory_space<vmem>>, %arg7: memref<1x4x1x8xf32, #tpu.memory_space<vmem>>) attributes {dimension_semantics = [#tpu.dimension_semantics<parallel>, #tpu.dimension_semantics<arbitrary>], iteration_bounds = array<i64: 2, 1>, scalar_prefetch = 0 : i64, scratch_operands = 0 : i64, tpu.core_type = #tpu.core_type<tc>, window_params = [{transform_indices = @transform_0, window_bounds = array<i64: 1, 4, 8, 32>}, {pipeline_mode = #tpu.pipeline_mode<synchronous>, transform_indices = @transform_1, window_bounds = array<i64: 4, 32, 8>}, {pipeline_mode = #tpu.pipeline_mode<synchronous>, transform_indices = @transform_2, window_bounds = array<i64: 4, 4, 1, 8>}, {transform_indices = @transform_3, window_bounds = array<i64: 1, 4, 8, 8>}, {transform_indices = @transform_4, window_bounds = array<i64: 1, 4, 1, 8>}, {transform_indices = @transform_5, window_bounds = array<i64: 1, 4, 1, 8>}]} {
    %c0 = arith.constant 0 : index
    %c0_0 = arith.constant 0 : index
    %c0_1 = arith.constant 0 : index
    %c0_2 = arith.constant 0 : index
    %0 = vector.load %arg2[%c0, %c0_0, %c0_1, %c0_2] : memref<1x4x8x32xf32, #tpu.memory_space<vmem>>, vector<1x4x8x32xf32>
    %1 = vector.shape_cast %0 : vector<1x4x8x32xf32> to vector<4x8x32xf32>
    %2 = vector.shape_cast %1 : vector<4x8x32xf32> to vector<32x32xf32>
    %c0_3 = arith.constant 0 : index
    %c0_4 = arith.constant 0 : index
    %c0_5 = arith.constant 0 : index
    %3 = vector.load %arg3[%c0_3, %c0_4, %c0_5] : memref<4x32x8xf32, #tpu.memory_space<vmem>>, vector<1x32x8xf32>
    %4 = vector.shape_cast %3 : vector<1x32x8xf32> to vector<32x8xf32>
    %cst = arith.constant dense<0.000000e+00> : vector<32x8xf32>
    %5 = tpu.matmul %2, %4, %cst {dimension_numbers = #tpu.dot_dimension_numbers<[1], [0], [0], [1], [0, 0, 1, 1], [], []>} : vector<32x32xf32>, vector<32x8xf32>, vector<32x8xf32> -> vector<32x8xf32>
    %c1 = arith.constant 1 : index
    %c0_6 = arith.constant 0 : index
    %c0_7 = arith.constant 0 : index
    %6 = vector.load %arg3[%c1, %c0_6, %c0_7] : memref<4x32x8xf32, #tpu.memory_space<vmem>>, vector<1x32x8xf32>
    %7 = vector.shape_cast %6 : vector<1x32x8xf32> to vector<32x8xf32>
    %cst_8 = arith.constant dense<0.000000e+00> : vector<32x8xf32>
    %8 = tpu.matmul %2, %7, %cst_8 {dimension_numbers = #tpu.dot_dimension_numbers<[1], [0], [0], [1], [0, 0, 1, 1], [], []>} : vector<32x32xf32>, vector<32x8xf32>, vector<32x8xf32> -> vector<32x8xf32>
    %c2 = arith.constant 2 : index
    %c0_9 = arith.constant 0 : index
    %c0_10 = arith.constant 0 : index
    %9 = vector.load %arg3[%c2, %c0_9, %c0_10] : memref<4x32x8xf32, #tpu.memory_space<vmem>>, vector<1x32x8xf32>
    %10 = vector.shape_cast %9 : vector<1x32x8xf32> to vector<32x8xf32>
    %cst_11 = arith.constant dense<0.000000e+00> : vector<32x8xf32>
    %11 = tpu.matmul %2, %10, %cst_11 {dimension_numbers = #tpu.dot_dimension_numbers<[1], [0], [0], [1], [0, 0, 1, 1], [], []>} : vector<32x32xf32>, vector<32x8xf32>, vector<32x8xf32> -> vector<32x8xf32>
    %c3 = arith.constant 3 : index
    %c0_12 = arith.constant 0 : index
    %c0_13 = arith.constant 0 : index
    %12 = vector.load %arg3[%c3, %c0_12, %c0_13] : memref<4x32x8xf32, #tpu.memory_space<vmem>>, vector<1x32x8xf32>
    %13 = vector.shape_cast %12 : vector<1x32x8xf32> to vector<32x8xf32>
    %cst_14 = arith.constant dense<0.000000e+00> : vector<32x8xf32>
    %14 = tpu.matmul %2, %13, %cst_14 {dimension_numbers = #tpu.dot_dimension_numbers<[1], [0], [0], [1], [0, 0, 1, 1], [], []>} : vector<32x32xf32>, vector<32x8xf32>, vector<32x8xf32> -> vector<32x8xf32>
    %15 = tpu.concatenate %5, %8, %11, %14 in 0 : vector<32x8xf32>, vector<32x8xf32>, vector<32x8xf32>, vector<32x8xf32> -> vector<128x8xf32>
    %16 = vector.shape_cast %15 : vector<128x8xf32> to vector<4x4x8x8xf32>
    %c0_15 = arith.constant 0 : index
    %c0_16 = arith.constant 0 : index
    %c0_17 = arith.constant 0 : index
    %c0_18 = arith.constant 0 : index
    %17 = vector.load %arg4[%c0_15, %c0_16, %c0_17, %c0_18] : memref<4x4x1x8xf32, #tpu.memory_space<vmem>>, vector<4x4x1x8xf32>
    %18 = vector.extract_strided_slice %16 {offsets = [0, 0, 0, 0], sizes = [4, 1, 8, 8], strides = [1, 1, 1, 1]} : vector<4x4x8x8xf32> to vector<4x1x8x8xf32>
    %19 = vector.shape_cast %18 : vector<4x1x8x8xf32> to vector<4x8x8xf32>
    %20 = vector.extract_strided_slice %17 {offsets = [0, 0, 0, 0], sizes = [1, 4, 1, 8], strides = [1, 1, 1, 1]} : vector<4x4x1x8xf32> to vector<1x4x1x8xf32>
    %21 = vector.shape_cast %20 : vector<1x4x1x8xf32> to vector<4x1x8xf32>
    %22 = vector.broadcast %21 : vector<4x1x8xf32> to vector<4x8x8xf32>
    %23 = arith.mulf %19, %22 : vector<4x8x8xf32>
    %24 = vector.extract_strided_slice %16 {offsets = [0, 1, 0, 0], sizes = [4, 1, 8, 8], strides = [1, 1, 1, 1]} : vector<4x4x8x8xf32> to vector<4x1x8x8xf32>
    %25 = vector.shape_cast %24 : vector<4x1x8x8xf32> to vector<4x8x8xf32>
    %26 = vector.extract_strided_slice %17 {offsets = [1, 0, 0, 0], sizes = [1, 4, 1, 8], strides = [1, 1, 1, 1]} : vector<4x4x1x8xf32> to vector<1x4x1x8xf32>
    %27 = vector.shape_cast %26 : vector<1x4x1x8xf32> to vector<4x1x8xf32>
    %28 = vector.broadcast %27 : vector<4x1x8xf32> to vector<4x8x8xf32>
    %29 = arith.mulf %25, %28 : vector<4x8x8xf32>
    %30 = arith.addf %23, %29 : vector<4x8x8xf32>
    %31 = vector.extract_strided_slice %16 {offsets = [0, 2, 0, 0], sizes = [4, 1, 8, 8], strides = [1, 1, 1, 1]} : vector<4x4x8x8xf32> to vector<4x1x8x8xf32>
    %32 = vector.shape_cast %31 : vector<4x1x8x8xf32> to vector<4x8x8xf32>
    %33 = vector.extract_strided_slice %17 {offsets = [2, 0, 0, 0], sizes = [1, 4, 1, 8], strides = [1, 1, 1, 1]} : vector<4x4x1x8xf32> to vector<1x4x1x8xf32>
    %34 = vector.shape_cast %33 : vector<1x4x1x8xf32> to vector<4x1x8xf32>
    %35 = vector.broadcast %34 : vector<4x1x8xf32> to vector<4x8x8xf32>
    %36 = arith.mulf %32, %35 : vector<4x8x8xf32>
    %37 = arith.addf %30, %36 : vector<4x8x8xf32>
    %38 = vector.extract_strided_slice %16 {offsets = [0, 3, 0, 0], sizes = [4, 1, 8, 8], strides = [1, 1, 1, 1]} : vector<4x4x8x8xf32> to vector<4x1x8x8xf32>
    %39 = vector.shape_cast %38 : vector<4x1x8x8xf32> to vector<4x8x8xf32>
    %40 = vector.extract_strided_slice %17 {offsets = [3, 0, 0, 0], sizes = [1, 4, 1, 8], strides = [1, 1, 1, 1]} : vector<4x4x1x8xf32> to vector<1x4x1x8xf32>
    %41 = vector.shape_cast %40 : vector<1x4x1x8xf32> to vector<4x1x8xf32>
    %42 = vector.broadcast %41 : vector<4x1x8xf32> to vector<4x8x8xf32>
    %43 = arith.mulf %39, %42 : vector<4x8x8xf32>
    %44 = arith.addf %37, %43 : vector<4x8x8xf32>
    %c0_19 = arith.constant 0 : index
    %c0_20 = arith.constant 0 : index
    %c0_21 = arith.constant 0 : index
    %c0_22 = arith.constant 0 : index
    %45 = vector.load %arg5[%c0_19, %c0_20, %c0_21, %c0_22] : memref<1x4x8x8xf32, #tpu.memory_space<vmem>>, vector<1x4x8x8xf32>
    %46 = vector.shape_cast %45 : vector<1x4x8x8xf32> to vector<4x8x8xf32>
    %47 = vector.shape_cast %44 : vector<4x8x8xf32> to vector<1x4x8x8xf32>
    tpu.vector_store %arg5[%c0_19, %c0_20, %c0_21, %c0_22], %47 {strides = array<i32>} : memref<1x4x8x8xf32, #tpu.memory_space<vmem>>, vector<1x4x8x8xf32>,
    %c0_i32 = arith.constant 0 : i32
    %48 = arith.cmpi eq, %arg1, %c0_i32 : i32
    %49 = arith.extui %48 : i1 to i32
    %c0_i32_23 = arith.constant 0 : i32
    %50 = arith.cmpi ne, %49, %c0_i32_23 : i32
    scf.if %50 {
      %cst_42 = arith.constant 0.000000e+00 : f32
      %68 = vector.broadcast %cst_42 : f32 to vector<4x1x8xf32>
      %c0_43 = arith.constant 0 : index
      %c0_44 = arith.constant 0 : index
      %c0_45 = arith.constant 0 : index
      %c0_46 = arith.constant 0 : index
      %69 = vector.load %arg6[%c0_43, %c0_44, %c0_45, %c0_46] : memref<1x4x1x8xf32, #tpu.memory_space<vmem>>, vector<1x4x1x8xf32>
      %70 = vector.shape_cast %69 : vector<1x4x1x8xf32> to vector<4x1x8xf32>
      %71 = vector.shape_cast %68 : vector<4x1x8xf32> to vector<1x4x1x8xf32>
      tpu.vector_store %arg6[%c0_43, %c0_44, %c0_45, %c0_46], %71 {strides = array<i32>} : memref<1x4x1x8xf32, #tpu.memory_space<vmem>>, vector<1x4x1x8xf32>,
      %cst_47 = arith.constant 0.000000e+00 : f32
      %72 = vector.broadcast %cst_47 : f32 to vector<4x1x8xf32>
      %c0_48 = arith.constant 0 : index
      %c0_49 = arith.constant 0 : index
      %c0_50 = arith.constant 0 : index
      %c0_51 = arith.constant 0 : index
      %73 = vector.load %arg7[%c0_48, %c0_49, %c0_50, %c0_51] : memref<1x4x1x8xf32, #tpu.memory_space<vmem>>, vector<1x4x1x8xf32>
      %74 = vector.shape_cast %73 : vector<1x4x1x8xf32> to vector<4x1x8xf32>
      %75 = vector.shape_cast %72 : vector<4x1x8xf32> to vector<1x4x1x8xf32>
      tpu.vector_store %arg7[%c0_48, %c0_49, %c0_50, %c0_51], %75 {strides = array<i32>} : memref<1x4x1x8xf32, #tpu.memory_space<vmem>>, vector<1x4x1x8xf32>,
    } else {
    }
    %c0_24 = arith.constant 0 : index
    %c0_25 = arith.constant 0 : index
    %c0_26 = arith.constant 0 : index
    %c0_27 = arith.constant 0 : index
    %51 = vector.load %arg6[%c0_24, %c0_25, %c0_26, %c0_27] : memref<1x4x1x8xf32, #tpu.memory_space<vmem>>, vector<1x4x1x8xf32>
    %52 = vector.shape_cast %51 : vector<1x4x1x8xf32> to vector<4x1x8xf32>
    %cst_28 = arith.constant dense<0.000000e+00> : vector<4x8xf32>
    %53 = vector.multi_reduction <add>, %44, %cst_28 [1] : vector<4x8x8xf32> to vector<4x8xf32>
    %54 = vector.shape_cast %53 : vector<4x8xf32> to vector<4x1x8xf32>
    %55 = arith.addf %52, %54 : vector<4x1x8xf32>
    %c0_29 = arith.constant 0 : index
    %c0_30 = arith.constant 0 : index
    %c0_31 = arith.constant 0 : index
    %c0_32 = arith.constant 0 : index
    %56 = vector.load %arg6[%c0_29, %c0_30, %c0_31, %c0_32] : memref<1x4x1x8xf32, #tpu.memory_space<vmem>>, vector<1x4x1x8xf32>
    %57 = vector.shape_cast %56 : vector<1x4x1x8xf32> to vector<4x1x8xf32>
    %58 = vector.shape_cast %55 : vector<4x1x8xf32> to vector<1x4x1x8xf32>
    tpu.vector_store %arg6[%c0_29, %c0_30, %c0_31, %c0_32], %58 {strides = array<i32>} : memref<1x4x1x8xf32, #tpu.memory_space<vmem>>, vector<1x4x1x8xf32>,
    %c0_33 = arith.constant 0 : index
    %c0_34 = arith.constant 0 : index
    %c0_35 = arith.constant 0 : index
    %c0_36 = arith.constant 0 : index
    %59 = vector.load %arg7[%c0_33, %c0_34, %c0_35, %c0_36] : memref<1x4x1x8xf32, #tpu.memory_space<vmem>>, vector<1x4x1x8xf32>
    %60 = vector.shape_cast %59 : vector<1x4x1x8xf32> to vector<4x1x8xf32>
    %61 = arith.mulf %44, %44 : vector<4x8x8xf32>
    %cst_37 = arith.constant dense<0.000000e+00> : vector<4x8xf32>
    %62 = vector.multi_reduction <add>, %61, %cst_37 [1] : vector<4x8x8xf32> to vector<4x8xf32>
    %63 = vector.shape_cast %62 : vector<4x8xf32> to vector<4x1x8xf32>
    %64 = arith.addf %60, %63 : vector<4x1x8xf32>
    %c0_38 = arith.constant 0 : index
    %c0_39 = arith.constant 0 : index
    %c0_40 = arith.constant 0 : index
    %c0_41 = arith.constant 0 : index
    %65 = vector.load %arg7[%c0_38, %c0_39, %c0_40, %c0_41] : memref<1x4x1x8xf32, #tpu.memory_space<vmem>>, vector<1x4x1x8xf32>
    %66 = vector.shape_cast %65 : vector<1x4x1x8xf32> to vector<4x1x8xf32>
    %67 = vector.shape_cast %64 : vector<4x1x8xf32> to vector<1x4x1x8xf32>
    tpu.vector_store %arg7[%c0_38, %c0_39, %c0_40, %c0_41], %67 {strides = array<i32>} : memref<1x4x1x8xf32, #tpu.memory_space<vmem>>, vector<1x4x1x8xf32>,
    return
  }
  func.func @transform_0(%arg0: i32, %arg1: i32) -> (i32, i32, i32, i32) {
    %c0_i32 = arith.constant 0 : i32
    %c0_i32_0 = arith.constant 0 : i32
    %c0_i32_1 = arith.constant 0 : i32
    return %arg0, %c0_i32, %arg1, %c0_i32_0 : i32, i32, i32, i32
  }
  func.func @transform_1(%arg0: i32, %arg1: i32) -> (i32, i32, i32) {
    %c0_i32 = arith.constant 0 : i32
    %c0_i32_0 = arith.constant 0 : i32
    %c0_i32_1 = arith.constant 0 : i32
    %c0_i32_2 = arith.constant 0 : i32
    return %c0_i32, %c0_i32_0, %c0_i32_1 : i32, i32, i32
  }
  func.func @transform_2(%arg0: i32, %arg1: i32) -> (i32, i32, i32, i32) {
    %c0_i32 = arith.constant 0 : i32
    %c0_i32_0 = arith.constant 0 : i32
    %c0_i32_1 = arith.constant 0 : i32
    %c0_i32_2 = arith.constant 0 : i32
    %c0_i32_3 = arith.constant 0 : i32
    return %c0_i32, %c0_i32_0, %c0_i32_1, %c0_i32_2 : i32, i32, i32, i32
  }
  func.func @transform_3(%arg0: i32, %arg1: i32) -> (i32, i32, i32, i32) {
    %c0_i32 = arith.constant 0 : i32
    %c0_i32_0 = arith.constant 0 : i32
    %c0_i32_1 = arith.constant 0 : i32
    return %arg0, %c0_i32, %arg1, %c0_i32_0 : i32, i32, i32, i32
  }
  func.func @transform_4(%arg0: i32, %arg1: i32) -> (i32, i32, i32, i32) {
    %c0_i32 = arith.constant 0 : i32
    %c0_i32_0 = arith.constant 0 : i32
    %c0_i32_1 = arith.constant 0 : i32
    %c0_i32_2 = arith.constant 0 : i32
    return %arg0, %c0_i32, %c0_i32_0, %c0_i32_1 : i32, i32, i32, i32
  }
  func.func @transform_5(%arg0: i32, %arg1: i32) -> (i32, i32, i32, i32) {
    %c0_i32 = arith.constant 0 : i32
    %c0_i32_0 = arith.constant 0 : i32
    %c0_i32_1 = arith.constant 0 : i32
    %c0_i32_2 = arith.constant 0 : i32
    return %arg0, %c0_i32, %c0_i32_0, %c0_i32_1 : i32, i32, i32, i32
  }
}

module attributes {stable_mosaic.version = 11 : i64} {
  func.func @_bn_apply_kernel(%arg0: i32, %arg1: memref<1x4x64xf32, #tpu.memory_space<vmem>>, %arg2: memref<4x1xf32, #tpu.memory_space<vmem>>, %arg3: memref<4x1xf32, #tpu.memory_space<vmem>>, %arg4: memref<1x4x64xf32, #tpu.memory_space<vmem>>) attributes {dimension_semantics = [#tpu.dimension_semantics<parallel>], iteration_bounds = array<i64: 2>, scalar_prefetch = 0 : i64, scratch_operands = 0 : i64, tpu.core_type = #tpu.core_type<tc>, window_params = [{transform_indices = @transform_0, window_bounds = array<i64: 1, 4, 64>}, {pipeline_mode = #tpu.pipeline_mode<synchronous>, transform_indices = @transform_1, window_bounds = array<i64: 4, 1>}, {pipeline_mode = #tpu.pipeline_mode<synchronous>, transform_indices = @transform_2, window_bounds = array<i64: 4, 1>}, {transform_indices = @transform_3, window_bounds = array<i64: 1, 4, 64>}]} {
    %c0 = arith.constant 0 : index
    %c0_0 = arith.constant 0 : index
    %c0_1 = arith.constant 0 : index
    %0 = vector.load %arg1[%c0, %c0_0, %c0_1] : memref<1x4x64xf32, #tpu.memory_space<vmem>>, vector<1x4x64xf32>
    %1 = vector.shape_cast %0 : vector<1x4x64xf32> to vector<4x64xf32>
    %c0_2 = arith.constant 0 : index
    %c0_3 = arith.constant 0 : index
    %2 = vector.load %arg2[%c0_2, %c0_3] : memref<4x1xf32, #tpu.memory_space<vmem>>, vector<4x1xf32>
    %3 = vector.broadcast %2 : vector<4x1xf32> to vector<4x64xf32>
    %4 = arith.mulf %1, %3 : vector<4x64xf32>
    %c0_4 = arith.constant 0 : index
    %c0_5 = arith.constant 0 : index
    %5 = vector.load %arg3[%c0_4, %c0_5] : memref<4x1xf32, #tpu.memory_space<vmem>>, vector<4x1xf32>
    %6 = vector.broadcast %5 : vector<4x1xf32> to vector<4x64xf32>
    %7 = arith.addf %4, %6 : vector<4x64xf32>
    %c0_6 = arith.constant 0 : index
    %c0_7 = arith.constant 0 : index
    %c0_8 = arith.constant 0 : index
    %8 = vector.load %arg4[%c0_6, %c0_7, %c0_8] : memref<1x4x64xf32, #tpu.memory_space<vmem>>, vector<1x4x64xf32>
    %9 = vector.shape_cast %8 : vector<1x4x64xf32> to vector<4x64xf32>
    %10 = vector.shape_cast %7 : vector<4x64xf32> to vector<1x4x64xf32>
    tpu.vector_store %arg4[%c0_6, %c0_7, %c0_8], %10 {strides = array<i32>} : memref<1x4x64xf32, #tpu.memory_space<vmem>>, vector<1x4x64xf32>,
    return
  }
  func.func @transform_0(%arg0: i32) -> (i32, i32, i32) {
    %c0_i32 = arith.constant 0 : i32
    %c0_i32_0 = arith.constant 0 : i32
    %c0_i32_1 = arith.constant 0 : i32
    return %arg0, %c0_i32, %c0_i32_0 : i32, i32, i32
  }
  func.func @transform_1(%arg0: i32) -> (i32, i32) {
    %c0_i32 = arith.constant 0 : i32
    %c0_i32_0 = arith.constant 0 : i32
    %c0_i32_1 = arith.constant 0 : i32
    return %c0_i32, %c0_i32_0 : i32, i32
  }
  func.func @transform_2(%arg0: i32) -> (i32, i32) {
    %c0_i32 = arith.constant 0 : i32
    %c0_i32_0 = arith.constant 0 : i32
    %c0_i32_1 = arith.constant 0 : i32
    return %c0_i32, %c0_i32_0 : i32, i32
  }
  func.func @transform_3(%arg0: i32) -> (i32, i32, i32) {
    %c0_i32 = arith.constant 0 : i32
    %c0_i32_0 = arith.constant 0 : i32
    %c0_i32_1 = arith.constant 0 : i32
    return %arg0, %c0_i32, %c0_i32_0 : i32, i32, i32
  }
}

</mosaic_0001>

<bundles_post_ra>
// kernel: patch_merging.3
= control target key start
LH: loop header
LB: loop body
LE: loop exit
PB: predicated region body
PF: predicated region fallthrough
CT: control target
= control target key end

     0   :  { %s284_s12 = smov 0   ;;  %s301_s0 = inlined_call_operand.vmem [shape: f32[2,4,64], index: 0, kind: input, shape index: {}, may-alias: {0,3}]   ;;  %s302_s1 = inlined_call_operand.vmem [shape: f32[4,1], index: 1, kind: input, shape index: {}]   ;;  %s303_s2 = inlined_call_operand.vmem [shape: f32[4,1], index: 2, kind: input, shape index: {}]   ;;  %s304_s3 = inlined_call_operand.vmem [shape: f32[2,4,64], index: 3, kind: output, shape index: {}, may-alias: {0,3}]  }
   0x1 LB: > { %s236_s13 = sadd.s32 4294967295, %s261_s12   ;;  %p240_p0 = scmp.ge.s32.totalorder %s261_s12, 1  ;;  %s261_s12 = sphi %s284_s12, %s13_s12  }
   0x2   : > { %p136_p1 = scmp.lt.s32.totalorder %s261_s12, 3 }
   0x4   : > { %p137_p2 = pnand %p240_p0, %p136_p1 }
   0x5   : > { %v167_v0 = vld [vmem:[%s302_s1] sm:$0xf] (!%p137_p2)  ;;  %v263_v1 = vmov (!%p137_p2), 0   ;;  %p158_p3 = scmp.lt.s32.totalorder (!%p137_p2), %s236_s13, 1  ;;  %vm181_vm0 = vcmask (!%p137_p2), 519168  }
   0x6   : > { %140 = sbr.rel (%p137_p2) target bundleno = 142 (0x8e), region = 32  ;;  %254 = vset.pattern.permute.xlu0 (!%p137_p2), %v263_v1  ;;  %v174_v2 = vld [vmem:[%s303_s2] sm:$0xf] (!%p137_p2) }
   0x7   : > { %170 = vperm.xlu0 (!%p137_p2), %254, %v167_v0  }
   0xb   : > { %177 = vperm.xlu0 (!%p137_p2), %254, %v174_v2  }
   0xd   : > { %s306_s13 = smov (!%p158_p3, %s236_s13), 1 }
   0xe   : > { %s241_s18 = sshll.u32 %s306_s13, 2 }
   0xf   : > { %s161_s21 = scalar_lea.vmem %s301_s0, %s241_s18  ;;  %s165_s24 = scalar_lea.vmem %s304_s3, %s241_s18 }
  0x10   : > { %v166_v4 = vld [vmem:[%s161_s21] sm:$0xf] }
  0x86   : > { %v171_v3 = vpop.permute.xlu0 %170 }
  0x87   : > { %v173_v5 = vmul.f32 %v171_v3, %v166_v4 }
  0x8a   : > { %v178_v6 = vpop.permute.xlu0 %177 }
  0x8b   : > { %v180_v7 = vadd.f32 %v178_v6, %v173_v5 }
  0x8d   : > { %182 = vst.msk [vmem:[%s165_s24] sm:$0xf] %vm181_vm0, %v180_v7 }
  0x8e PF: > { %s13_s12 = sadd.s32 1, %s261_s12  }
  0x8f   : > { %p10_p4 = scmp.ge.s32.totalorder %s13_s12, 4  }
  0x91   :  { %12 = sbr.rel (!%p10_p4) target bundleno = 1 (0x1), region = 62 }

// kernel: patch_merging.2
= control target key start
LH: loop header
LB: loop body
LE: loop exit
PB: predicated region body
PF: predicated region fallthrough
CT: control target
= control target key end

     0   :  { %s1300_s18 = smov 0   ;;  %s1302_s19 = smov 0   ;;  %s1521_s0 = inlined_call_operand.vmem [shape: f32[2,4,8,32], index: 0, kind: input, shape index: {}]   ;;  %s1522_s1 = inlined_call_operand.vmem [shape: f32[4,32,8], index: 1, kind: input, shape index: {}]   ;;  %s1523_s2 = inlined_call_operand.vmem [shape: f32[4,4,1,8], index: 2, kind: input, shape index: {}]   ;;  %s1524_s3 = inlined_call_operand.vmem [shape: f32[2,4,8,8], index: 3, kind: output, shape index: {0}]   ;;  %s1525_s4 = inlined_call_operand.vmem [shape: f32[2,4,1,8], index: 4, kind: output, shape index: {1}]   ;;  %s1526_s5 = inlined_call_operand.vmem [shape: f32[2,4,1,8], index: 5, kind: output, shape index: {2}]  }
   0x1   :  { %s1304_s20 = smov 0  }
   0x2 LB: > { %s28_s21 = sadd.s32 1, %s1263_s19  ;;  %p1045_p0 = scmp.ge.s32.totalorder %s1267_s20, 1  ;;  %s1267_s20 = sphi %s1304_s20, %s16_s20   ;;  %s1263_s19 = sphi %s1302_s19, %s1528_s19   ;;  %s1259_s18 = sphi %s1300_s18, %s1527_s18  }
   0x3   : > { %p30_p1 = scmp.ge.s32.totalorder %s28_s21, 2  ;;  %p211_p2 = scmp.lt.s32.totalorder %s1267_s20, 3 }
   0x5   : > { %s1530_s21 = smov (%p30_p1, %s28_s21), 0  ;;  %p212_p3 = pnand %p1045_p0, %p211_p2 }
   0x6   : > { %v281_v0 = vld [vmem:[%s1522_s1] sm:$0xff] (!%p212_p3)  ;;  %v282_v1 = vld [vmem:[%s1522_s1 + $0x8] sm:$0xff] (!%p212_p3)  ;;  %p253_p4 = scmp.lt.s32.totalorder (!%p212_p3), %s1259_s18, 1  ;;  %v283_v5 = vld [vmem:[%s1522_s1 + $0x10] sm:$0xff] (!%p212_p3)  ;;  %vm285_vm0 = vcmask (!%p212_p3), 261120   ;;  %vm802_vm1 = vcmask (!%p212_p3), 57344  }
   0x7   : > { %215 = sbr.rel (%p212_p3) target bundleno = 271 (0x10f), region = 32  ;;  %v1056_v2 = vld [vmem:[%s1522_s1 + $0x20] sm:$0xff] (!%p212_p3)  ;;  %v1188_v3 = vpack.c.bf16 (!%p212_p3), %v282_v1, %v281_v0  ;;  %v1057_v4 = vld [vmem:[%s1522_s1 + $0x28] sm:$0xff] (!%p212_p3)  ;;  %v284_v6 = vld [vmem:[%s1522_s1 + $0x18] sm:$0xff] (!%p212_p3)  ;;  %v1269_v28 = vmov (!%p212_p3), 0.0   ;;  %vm793_vm2 = vcmask (!%p212_p3), 64512  }
   0x8   : > { %v1196_v7 = vpack.c.bf16 (!%p212_p3), %v1057_v4, %v1056_v2  ;;  %v1192_v8 = vpack.c.bf16 (!%p212_p3), %v284_v6, %v283_v5  ;;  %v1058_v9 = vld [vmem:[%s1522_s1 + $0x30] sm:$0xff] (!%p212_p3)  ;;  %v1059_v10 = vld [vmem:[%s1522_s1 + $0x38] sm:$0xff] (!%p212_p3)  ;;  %v1064_v11 = vld [vmem:[%s1522_s1 + $0x40] sm:$0xff] (!%p212_p3) }
   0x9   : > { %1189 = vmatprep.subr.bf16.mxu0 (!%p212_p3), %v1188_v3  ;;  %v1200_v12 = vpack.c.bf16 (!%p212_p3), %v1059_v10, %v1058_v9  ;;  %v1065_v13 = vld [vmem:[%s1522_s1 + $0x48] sm:$0xff] (!%p212_p3)  ;;  %v1072_v14 = vld [vmem:[%s1522_s1 + $0x60] sm:$0xff] (!%p212_p3)  ;;  %v1066_v19 = vld [vmem:[%s1522_s1 + $0x50] sm:$0xff] (!%p212_p3) }
   0xa   : > { %v1073_v15 = vld [vmem:[%s1522_s1 + $0x68] sm:$0xff] (!%p212_p3)  ;;  %1197 = vmatprep.subr.bf16.mxu1 (!%p212_p3), %v1196_v7  ;;  %1191 = vmatpush3.bf16.msra.mxu0 (!%p212_p3), %v1188_v3  ;;  %v1204_v16 = vpack.c.bf16 (!%p212_p3), %v1065_v13, %v1064_v11  ;;  %v1067_v20 = vld [vmem:[%s1522_s1 + $0x58] sm:$0xff] (!%p212_p3)  ;;  %v1074_v22 = vld [vmem:[%s1522_s1 + $0x70] sm:$0xff] (!%p212_p3) }
   0xb   : > { %1199 = vmatpush3.bf16.msra.mxu1 (!%p212_p3), %v1196_v7  ;;  %1193 = vmatprep.subr.bf16.mxu0 (!%p212_p3), %v1192_v8  ;;  %v1212_v18 = vpack.c.bf16 (!%p212_p3), %v1073_v15, %v1072_v14  ;;  %v1075_v23 = vld [vmem:[%s1522_s1 + $0x78] sm:$0xff] (!%p212_p3)  ;;  %v1208_v25 = vpack.c.bf16 (!%p212_p3), %v1067_v20, %v1066_v19  ;;  %v1084_v29 = vld [vmem:[%s1523_s2 + $0x4] ss:$0 sm:$0xff] (!%p212_p3)  ;;  %v1085_v30 = vld [vmem:[%s1523_s2 + $0x5] ss:$0 sm:$0xff] (!%p212_p3) }
   0xc   : > { %1201 = vmatprep.subr.bf16.mxu1 (!%p212_p3), %v1200_v12  ;;  %v1216_v26 = vpack.c.bf16 (!%p212_p3), %v1075_v23, %v1074_v22  ;;  %v1080_v31 = vld [vmem:[%s1523_s2] ss:$0 sm:$0xff] (!%p212_p3)  ;;  %v1081_v33 = vld [vmem:[%s1523_s2 + $0x1] ss:$0 sm:$0xff] (!%p212_p3)  ;;  %v1088_v41 = vld [vmem:[%s1523_s2 + $0x8] ss:$0 sm:$0xff] (!%p212_p3) }
   0xd   : > { %v1089_v44 = vld [vmem:[%s1523_s2 + $0x9] ss:$0 sm:$0xff] (!%p212_p3)  ;;  %v1092_v46 = vld [vmem:[%s1523_s2 + $0xc] ss:$0 sm:$0xff] (!%p212_p3)  ;;  %v1093_v49 = vld [vmem:[%s1523_s2 + $0xd] ss:$0 sm:$0xff] (!%p212_p3) }
   0xe   : > { %s1532_s18 = smov (!%p253_p4, %s1259_s18), 1  ;;  %1195 = vmatpush3.bf16.msra.mxu0 %v1192_v8  ;;  %v1086_v52 = vld [vmem:[%s1523_s2 + $0x6] ss:$0 sm:$0xff]  ;;  %v1087_v54 = vld [vmem:[%s1523_s2 + $0x7] ss:$0 sm:$0xff] }
   0xf   : > { %s1098_s25 = sshll.u32 %s1532_s18, 5  ;;  %1203 = vmatpush3.bf16.msra.mxu1 %v1200_v12  ;;  %1205 = vmatprep.subr.bf16.mxu0 %v1204_v16  ;;  %s1050_s12 = sshll.u32 %s1532_s18, 2  ;;  %v1082_v55 = vld [vmem:[%s1523_s2 + $0x2] ss:$0 sm:$0xff]  ;;  %v1083_v59 = vld [vmem:[%s1523_s2 + $0x3] ss:$0 sm:$0xff] }
  0x10   : > { %s260_s28 = scalar_lea.vmem %s1521_s0, %s1098_s25  ;;  %1213 = vmatprep.subr.bf16.mxu1 %v1212_v18  ;;  %s1394_s15 = scalar_lea.vmem %s1525_s4, %s1050_s12  ;;  %v1090_v11 = vld [vmem:[%s1523_s2 + $0xa] ss:$0 sm:$0xff] }
  0x11   : > { %v277_v17 = vld [vmem:[%s260_s28] sm:$0xff]  ;;  %v278_v21 = vld [vmem:[%s260_s28 + $0x8] sm:$0xff]  ;;  %v279_v24 = vld [vmem:[%s260_s28 + $0x10] sm:$0xff]  ;;  %s1399_s22 = scalar_lea.vmem %s1526_s5, %s1050_s12  ;;  %803 = vst.msk [vmem:[%s1394_s15] sm:$0x1] %vm802_vm1, %v1269_v28  ;;  %s1458_s7 = scalar_lea.vmem %s1524_s3, %s1098_s25 }
  0x12   : > { %1140 = vmatprep.mubr.msk.f32.mxu0 %vm285_vm0, %v277_v17  ;;  %1154 = vmatprep.mubr.msk.f32.mxu1 %vm285_vm0, %v277_v17  ;;  %v280_v27 = vld [vmem:[%s260_s28 + $0x18] sm:$0xff]  ;;  %807 = vst.msk [vmem:[%s1399_s22] sm:$0x1] %vm802_vm1, %v1269_v28  ;;  %804 = vst.msk [vmem:[%s1394_s15 + $0x1] sm:$0x1] %vm802_vm1, %v1269_v28 }
  0x13   : > { %1141 = vmatmul.mubr.msk.f32.vlgmr.msra.gmra.mrb[0].mxu0 %vm285_vm0, %v278_v21  ;;  %1155 = vmatmul.mubr.msk.f32.vlgmr.msra.gmra.mrb[0].mxu1 %vm285_vm0, %v278_v21  ;;  %805 = vst.msk [vmem:[%s1394_s15 + $0x2] sm:$0x1] %vm802_vm1, %v1269_v28  ;;  %806 = vst.msk [vmem:[%s1394_s15 + $0x3] sm:$0x1] %vm802_vm1, %v1269_v28 }
  0x14   : > { %1207 = vmatpush3.bf16.msra.mxu0 %v1204_v16  ;;  %1215 = vmatpush3.bf16.msra.mxu1 %v1212_v18  ;;  %808 = vst.msk [vmem:[%s1399_s22 + $0x1] sm:$0x1] %vm802_vm1, %v1269_v28  ;;  %809 = vst.msk [vmem:[%s1399_s22 + $0x2] sm:$0x1] %vm802_vm1, %v1269_v28  ;;  %v1091_v18 = vld [vmem:[%s1523_s2 + $0xb] ss:$0 sm:$0xff] }
  0x15   : > { %1143 = vmatprep.mubr.msk.f32.mxu0 %vm285_vm0, %v279_v24  ;;  %1157 = vmatprep.mubr.msk.f32.mxu1 %vm285_vm0, %v279_v24  ;;  %810 = vst.msk [vmem:[%s1399_s22 + $0x3] sm:$0x1] %vm802_vm1, %v1269_v28 }
  0x16   : > { %1209 = vmatprep.subr.bf16.mxu0 %v1208_v25  ;;  %1217 = vmatprep.subr.bf16.mxu1 %v1216_v26 }
  0x17   : > { %1144 = vmatmul.mubr.msk.f32.gmra.mrb[2].mxu0 %vm285_vm0, %v280_v27  ;;  %1158 = vmatmul.mubr.msk.f32.gmra.mrb[2].mxu1 %vm285_vm0, %v280_v27 }
  0x18   : > { %1211 = vmatpush3.bf16.msra.mxu0 %v1208_v25  ;;  %1219 = vmatpush3.bf16.msra.mxu1 %v1216_v26  ;;  %v1095_v26 = vld [vmem:[%s1523_s2 + $0xf] ss:$0 sm:$0xff] }
  0x19   : > { %1168 = vmatprep.mubr.msk.f32.mxu0 %vm285_vm0, %v277_v17  ;;  %1182 = vmatprep.mubr.msk.f32.mxu1 %vm285_vm0, %v277_v17 }
  0x1b   : > { %1169 = vmatmul.mubr.msk.f32.vlgmr.msra.gmra.mrb[4].mxu0 %vm285_vm0, %v278_v21  ;;  %1183 = vmatmul.mubr.msk.f32.vlgmr.msra.gmra.mrb[4].mxu1 %vm285_vm0, %v278_v21  ;;  %v1094_v21 = vld [vmem:[%s1523_s2 + $0xe] ss:$0 sm:$0xff] }
  0x1c   : > { %1171 = vmatprep.mubr.msk.f32.mxu0 %vm285_vm0, %v279_v24  ;;  %1185 = vmatprep.mubr.msk.f32.mxu1 %vm285_vm0, %v279_v24 }
  0x1f   : > { %1172 = vmatmul.mubr.msk.f32.gmra.mrb[6].mxu0 %vm285_vm0, %v280_v27  ;;  %1186 = vmatmul.mubr.msk.f32.gmra.mrb[6].mxu1 %vm285_vm0, %v280_v27 }
  0xe6   : > { %v1142_v32 = vpop.f32.mrb[0].mxu0  ;;  %v1156_v35 = vpop.f32.mrb[0].mxu1 }
  0xe7   : > { %v721_v34 = vmul.f32 %v1142_v32, %v1084_v29  ;;  %v364_v36 = vpop.f32.mrb[1].mxu0  ;;  %v722_v37 = vmul.f32 %v1156_v35, %v1085_v30  ;;  %v454_v39 = vpop.f32.mrb[1].mxu1 }
  0xe8   : > { %v693_v38 = vmul.f32 %v1080_v31, %v364_v36  ;;  %v694_v40 = vmul.f32 %v1081_v33, %v454_v39 }
  0xea   : > { %v725_v42 = vadd.f32 %v721_v34, %v693_v38  ;;  %v1145_v43 = vpop.f32.mrb[2].mxu0  ;;  %v726_v45 = vadd.f32 %v722_v37, %v694_v40  ;;  %v1159_v47 = vpop.f32.mrb[2].mxu1 }
  0xeb   : > { %v374_v48 = vpop.f32.mrb[3].mxu0  ;;  %v464_v51 = vpop.f32.mrb[3].mxu1  ;;  %v785_v56 = vmul.f32 %v1145_v43, %v1092_v46  ;;  %v786_v60 = vmul.f32 %v1159_v47, %v1093_v49  ;;  %v811_v49 = vld [vmem:[%s1394_s15] sm:$0x1] }
  0xec   : > { %v753_v50 = vmul.f32 %v1088_v41, %v374_v48  ;;  %v754_v53 = vmul.f32 %v1089_v44, %v464_v51 }
  0xee   : > { %v757_v57 = vadd.f32 %v753_v50, %v725_v42  ;;  %v1170_v58 = vpop.f32.mrb[4].mxu0  ;;  %v758_v61 = vadd.f32 %v754_v53, %v726_v45  ;;  %v1184_v63 = vpop.f32.mrb[4].mxu1 }
  0xef   : > { %v723_v62 = vmul.f32 %v1170_v58, %v1086_v52  ;;  %v544_v0 = vpop.f32.mrb[5].mxu0  ;;  %v724_v2 = vmul.f32 %v1184_v63, %v1087_v54  ;;  %v634_v4 = vpop.f32.mrb[5].mxu1 }
  0xf0   : > { %v789_v1 = vadd.f32 %v785_v56, %v757_v57  ;;  %v695_v3 = vmul.f32 %v1082_v55, %v544_v0  ;;  %v790_v5 = vadd.f32 %v786_v60, %v758_v61  ;;  %v696_v6 = vmul.f32 %v1083_v59, %v634_v4  ;;  %v812_v56 = vld [vmem:[%s1394_s15 + $0x1] sm:$0x1]  ;;  %v852_v59 = vld [vmem:[%s1399_s22] sm:$0x1] }
  0xf2   : > { %794 = vst.msk [vmem:[%s1458_s7] sm:$0xff] %vm793_vm2, %v789_v1  ;;  %v815_v7 = vsel %vm793_vm2, %v789_v1, 0.0  ;;  %v856_v8 = vmul.f32 %v789_v1, %v789_v1  ;;  %v727_v9 = vadd.f32 %v723_v62, %v695_v3  ;;  %v1173_v10 = vpop.f32.mrb[6].mxu0  ;;  %795 = vst.msk [vmem:[%s1458_s7 + $0x8] sm:$0xff] %vm793_vm2, %v790_v5  ;;  %v822_v13 = vsel %vm793_vm2, %v790_v5, 0.0  ;;  %v1187_v16 = vpop.f32.mrb[6].mxu1 }
  0xf3   : > { %v816_v12 = vrot.slane %v815_v7, 4  ;;  %v857_v14 = vmul.f32 %v790_v5, %v790_v5  ;;  %v728_v15 = vadd.f32 %v724_v2, %v696_v6  ;;  %v554_v17 = vpop.f32.mrb[7].mxu0  ;;  %v823_v20 = vrot.slane %v822_v13, 4  ;;  %v644_v22 = vpop.f32.mrb[7].mxu1  ;;  %v853_v2 = vld [vmem:[%s1399_s22 + $0x1] sm:$0x1] }
  0xf4   : > { %v860_v19 = vsel %vm793_vm2, %v856_v8, 0.0  ;;  %v755_v27 = vmul.f32 %v1090_v11, %v554_v17  ;;  %v756_v30 = vmul.f32 %v1091_v18, %v644_v22  ;;  %v787_v33 = vmul.f32 %v1173_v10, %v1094_v21 }
  0xf5   : > { %v817_v23 = vadd.f32 %v816_v12, %v815_v7  ;;  %v861_v24 = vrot.slane %v860_v19, 4  ;;  %v867_v25 = vsel %vm793_vm2, %v857_v14, 0.0  ;;  %v824_v28 = vadd.f32 %v823_v20, %v822_v13  ;;  %v813_v20 = vld [vmem:[%s1394_s15 + $0x2] sm:$0x1] }
  0xf6   : > { %v868_v29 = vrot.slane %v867_v25, 4  ;;  %v759_v34 = vadd.f32 %v755_v27, %v727_v9  ;;  %v788_v37 = vmul.f32 %v1187_v16, %v1095_v26  ;;  %v760_v38 = vadd.f32 %v756_v30, %v728_v15  ;;  %v854_v26 = vld [vmem:[%s1399_s22 + $0x2] sm:$0x1] }
  0xf7   : > { %v818_v31 = vrot.slane %v817_v23, 2  ;;  %v862_v32 = vadd.f32 %v861_v24, %v860_v19  ;;  %v825_v35 = vrot.slane %v824_v28, 2  ;;  %v814_v24 = vld [vmem:[%s1394_s15 + $0x3] sm:$0x1] }
  0xf8   : > { %v869_v36 = vadd.f32 %v868_v29, %v867_v25  ;;  %v791_v41 = vadd.f32 %v787_v33, %v759_v34  ;;  %v792_v44 = vadd.f32 %v788_v37, %v760_v38  ;;  %v855_v34 = vld [vmem:[%s1399_s22 + $0x3] sm:$0x1] }
  0xf9   : > { %v819_v39 = vadd.f32 %v818_v31, %v817_v23  ;;  %v863_v40 = vrot.slane %v862_v32, 2  ;;  %v826_v42 = vadd.f32 %v825_v35, %v824_v28 }
  0xfa   : > { %v870_v43 = vrot.slane %v869_v36, 2  ;;  %796 = vst.msk [vmem:[%s1458_s7 + $0x10] sm:$0xff] %vm793_vm2, %v791_v41  ;;  %v829_v47 = vsel %vm793_vm2, %v791_v41, 0.0  ;;  %v858_v48 = vmul.f32 %v791_v41, %v791_v41  ;;  %797 = vst.msk [vmem:[%s1458_s7 + $0x18] sm:$0xff] %vm793_vm2, %v792_v44  ;;  %v836_v53 = vsel %vm793_vm2, %v792_v44, 0.0 }
  0xfb   : > { %v820_v45 = vrot.slane %v819_v39, 1  ;;  %v864_v46 = vadd.f32 %v863_v40, %v862_v32  ;;  %v827_v50 = vrot.slane %v826_v42, 1  ;;  %v830_v52 = vrot.slane %v829_v47, 4 }
  0xfc   : > { %v871_v51 = vadd.f32 %v870_v43, %v869_v36  ;;  %v874_v57 = vsel %vm793_vm2, %v858_v48, 0.0  ;;  %v837_v58 = vrot.slane %v836_v53, 4  ;;  %v859_v4 = vmul.f32 %v792_v44, %v792_v44 }
  0xfd   : > { %v821_v54 = vadd.f32 %v820_v45, %v819_v39  ;;  %v865_v55 = vrot.slane %v864_v46, 1  ;;  %v828_v60 = vadd.f32 %v827_v50, %v826_v42  ;;  %v831_v62 = vadd.f32 %v830_v52, %v829_v47 }
  0xfe   : > { %v872_v61 = vrot.slane %v871_v51, 1  ;;  %v875_v63 = vrot.slane %v874_v57, 4  ;;  %v838_v3 = vadd.f32 %v837_v58, %v836_v53  ;;  %v881_v11 = vsel %vm793_vm2, %v859_v4, 0.0 }
  0xff   : > { %v843_v0 = vadd.f32 %v821_v54, %v811_v49  ;;  %v866_v1 = vadd.f32 %v865_v55, %v864_v46  ;;  %v844_v5 = vadd.f32 %v828_v60, %v812_v56  ;;  %v832_v7 = vrot.slane %v831_v62, 2 }
 0x100   : > { %v873_v6 = vadd.f32 %v872_v61, %v871_v51  ;;  %v876_v8 = vadd.f32 %v875_v63, %v874_v57  ;;  %v839_v10 = vrot.slane %v838_v3, 2  ;;  %v882_v15 = vrot.slane %v881_v11, 4 }
 0x101   : > { %848 = vst.msk [vmem:[%s1394_s15] sm:$0x1] %vm802_vm1, %v843_v0  ;;  %v888_v9 = vadd.f32 %v866_v1, %v852_v59  ;;  %849 = vst.msk [vmem:[%s1394_s15 + $0x1] sm:$0x1] %vm802_vm1, %v844_v5  ;;  %v833_v13 = vadd.f32 %v832_v7, %v831_v62 }
 0x102   : > { %v889_v12 = vadd.f32 %v873_v6, %v853_v2  ;;  %v877_v14 = vrot.slane %v876_v8, 2  ;;  %v840_v16 = vadd.f32 %v839_v10, %v838_v3  ;;  %v883_v19 = vadd.f32 %v882_v15, %v881_v11 }
 0x103   : > { %892 = vst.msk [vmem:[%s1399_s22] sm:$0x1] %vm802_vm1, %v888_v9  ;;  %v834_v17 = vrot.slane %v833_v13, 1 }
 0x104   : > { %893 = vst.msk [vmem:[%s1399_s22 + $0x1] sm:$0x1] %vm802_vm1, %v889_v12  ;;  %v878_v18 = vadd.f32 %v877_v14, %v876_v8  ;;  %v841_v21 = vrot.slane %v840_v16, 1  ;;  %v884_v25 = vrot.slane %v883_v19, 2 }
 0x105   : > { %v835_v22 = vadd.f32 %v834_v17, %v833_v13 }
 0x106   : > { %v879_v23 = vrot.slane %v878_v18, 1  ;;  %v842_v27 = vadd.f32 %v841_v21, %v840_v16  ;;  %v885_v30 = vadd.f32 %v884_v25, %v883_v19 }
 0x107   : > { %v845_v28 = vadd.f32 %v835_v22, %v813_v20 }
 0x108   : > { %v880_v29 = vadd.f32 %v879_v23, %v878_v18  ;;  %v846_v31 = vadd.f32 %v842_v27, %v814_v24  ;;  %v886_v33 = vrot.slane %v885_v30, 1 }
 0x109   : > { %850 = vst.msk [vmem:[%s1394_s15 + $0x2] sm:$0x1] %vm802_vm1, %v845_v28 }
 0x10a   : > { %v890_v32 = vadd.f32 %v880_v29, %v854_v26  ;;  %851 = vst.msk [vmem:[%s1394_s15 + $0x3] sm:$0x1] %vm802_vm1, %v846_v31  ;;  %v887_v35 = vadd.f32 %v886_v33, %v885_v30 }
 0x10c   : > { %894 = vst.msk [vmem:[%s1399_s22 + $0x2] sm:$0x1] %vm802_vm1, %v890_v32  ;;  %v891_v36 = vadd.f32 %v887_v35, %v855_v34 }
 0x10e   : > { %895 = vst.msk [vmem:[%s1399_s22 + $0x3] sm:$0x1] %vm802_vm1, %v891_v36 }
 0x10f PF: > { %s16_s20 = sadd.s32 1, %s1267_s20   ;;  %s1527_s18 = smov %s1263_s19 }
 0x110   : > { %p13_p5 = scmp.ge.s32.totalorder %s16_s20, 4   ;;  %s1528_s19 = smov %s1530_s21 }
 0x112   :  { %15 = sbr.rel (!%p13_p5) target bundleno = 2 (0x2), region = 93 }

</bundles_post_ra>
